<compile_context>
chip_gen: v5e
topology: v5e:2x2
jax: 0.10.0
libtpu: 0.0.40
codegen_flags: <defaults>
</compile_context>

<pallas_src>
import math

import jax
import jax.numpy as jnp
from jax.experimental import pallas as pl
from jax.experimental.pallas import tpu as pltpu


def _tile(dim, preferred, align=128):
    """Largest tile <= preferred that divides `dim`.

    Prefers multiples of `align` (lane width); never silently falls back to a
    huge full-dim block that could blow the scoped VMEM limit.
    """
    if dim <= preferred:
        return dim
    if dim % preferred == 0:
        return preferred
    for cand in range((preferred // align) * align, 0, -align):
        if dim % cand == 0:
            return cand
    for cand in range(preferred, 0, -1):
        if dim % cand == 0:
            return cand
    return dim


# ---------------------------------------------------------------------------
# Tiled linear:  y = x @ W + b     (x, W already bf16; f32 accumulation)
# ---------------------------------------------------------------------------
def _linear_kernel(x_ref, w_ref, b_ref, o_ref, acc_ref):
    @pl.when(pl.program_id(2) == 0)
    def _():
        acc_ref[...] = jnp.zeros_like(acc_ref)

    # Operands arrive in bf16 (no per-tile cast); accumulate in f32 on the MXU.
    acc_ref[...] += jnp.dot(x_ref[...], w_ref[...],
                            preferred_element_type=jnp.float32)

    @pl.when(pl.program_id(2) == pl.num_programs(2) - 1)
    def _():
        o_ref[...] = (acc_ref[...] + b_ref[...]).astype(o_ref.dtype)


def linear(x2d, w, b, *, out_dtype=None, tm=256, tn=512, tk=512):
    # Defaults sized for v6e (large tn/tk also cut redundant W re-streaming);
    # on v5e prefer tm=128, tn=256, tk=256.
    M, K = x2d.shape
    _, N = w.shape
    out_dtype = x2d.dtype if out_dtype is None else out_dtype
    tm, tn, tk = _tile(M, tm), _tile(N, tn), _tile(K, tk)
    return pl.pallas_call(
        _linear_kernel,
        out_shape=jax.ShapeDtypeStruct((M, N), out_dtype),
        grid_spec=pltpu.PrefetchScalarGridSpec(
            num_scalar_prefetch=0,
            grid=(M // tm, N // tn, K // tk),
            in_specs=[
                pl.BlockSpec((tm, tk), lambda i, j, k: (i, k)),
                pl.BlockSpec((tk, tn), lambda i, j, k: (k, j)),
                pl.BlockSpec((1, tn), lambda i, j, k: (0, j)),
            ],
            out_specs=pl.BlockSpec((tm, tn), lambda i, j, k: (i, j)),
            scratch_shapes=[pltpu.VMEM((tm, tn), jnp.float32)],
        ),
        compiler_params=pltpu.CompilerParams(
            dimension_semantics=("parallel", "parallel", "arbitrary")),
    )(x2d, w, b)


# ---------------------------------------------------------------------------
# Flash attention (causal, online softmax), reading q/k/v straight from the
# c_attn output layout and writing merged-head output (no HBM transposes).
#   qkv: (B, T, 3, H, d)  ->  out: (B, T, H, d)
# ---------------------------------------------------------------------------
def _flash_kernel(q_ref, k_ref, v_ref, o_ref, m_ref, l_ref, acc_ref):
    qi = pl.program_id(2)
    ki = pl.program_id(3)

    @pl.when(ki == 0)
    def _():
        m_ref[...] = jnp.full(m_ref.shape, -jnp.inf, dtype=m_ref.dtype)
        l_ref[...] = jnp.zeros_like(l_ref)
        acc_ref[...] = jnp.zeros_like(acc_ref)

    def process(masked):
        # q, k, v blocks are 2-D per head: (tq, d), (tk, d), (tk, d), bf16.
        s = jax.lax.dot_general(
            q_ref[...], k_ref[...],
            dimension_numbers=(((1,), (1,)), ((), ())),
            preferred_element_type=jnp.float32)              # (tq, tk)

        if masked:
            # Only the diagonal block needs the causal mask (tq == tk, so the
            # q/k offsets coincide and the condition is simply row >= col).
            tq, tk = s.shape
            row = jax.lax.broadcasted_iota(jnp.int32, (tq, tk), 0)
            col = jax.lax.broadcasted_iota(jnp.int32, (tq, tk), 1)
            s = jnp.where(row >= col, s, -1e10)

        m_prev = m_ref[...]                                  # (tq, 1)
        m_new = jnp.maximum(m_prev, jnp.max(s, axis=-1, keepdims=True))
        alpha = jnp.exp(m_prev - m_new)
        p = jnp.exp(s - m_new)                               # (tq, tk)
        l_ref[...] = alpha * l_ref[...] + jnp.sum(p, axis=-1, keepdims=True)
        acc_ref[...] = alpha * acc_ref[...] + jnp.dot(
            p.astype(v_ref.dtype), v_ref[...],
            preferred_element_type=jnp.float32)              # (tq, d)
        m_ref[...] = m_new

    # Off-diagonal (fully unmasked) blocks: no iota / compare / where.
    @pl.when(ki < qi)
    def _():
        process(masked=False)

    # Diagonal block: mask, then finalize (all later ki blocks are fully
    # masked: their compute is skipped and their K/V DMA is clamped away).
    @pl.when(ki == qi)
    def _():
        process(masked=True)
        o_ref[...] = (acc_ref[...] * pl.reciprocal(l_ref[...], approx=True)
                      ).astype(o_ref.dtype)


def flash_attention(qkv, *, block=256):
    """Causal flash attention on the raw c_attn output.

    qkv: (B, T, 3, H, d) -- the c_attn output reshaped (free, no transpose).
    Returns (B, T, H, d), i.e. merged-head layout (reshape to (B,T,H*d) is free).
    """
    B, T, _, H, d = qkv.shape
    t = _tile(T, block)          # single tile size for q and k (diagonal aligns)
    n_t = T // t

    def q_map(b, h, qi, ki):
        return (b, qi, 0, h, 0)

    def k_map(b, h, qi, ki):
        # Clamp fully-masked (ki > qi) steps onto the previous block index so
        # Pallas issues no new K/V DMA for them.
        return (b, jnp.minimum(ki, qi), 1, h, 0)

    def v_map(b, h, qi, ki):
        return (b, jnp.minimum(ki, qi), 2, h, 0)

    return pl.pallas_call(
        _flash_kernel,
        out_shape=jax.ShapeDtypeStruct((B, T, H, d), qkv.dtype),
        grid_spec=pltpu.PrefetchScalarGridSpec(
            num_scalar_prefetch=0,
            grid=(B, H, n_t, n_t),
            in_specs=[
                pl.BlockSpec((None, t, None, None, d), q_map),
                pl.BlockSpec((None, t, None, None, d), k_map),
                pl.BlockSpec((None, t, None, None, d), v_map),
            ],
            out_specs=pl.BlockSpec((None, t, None, d),
                                   lambda b, h, qi, ki: (b, qi, h, 0)),
            scratch_shapes=[
                pltpu.VMEM((t, 1), jnp.float32),   # running max m
                pltpu.VMEM((t, 1), jnp.float32),   # running denom l
                pltpu.VMEM((t, d), jnp.float32),   # output accumulator
            ],
        ),
        compiler_params=pltpu.CompilerParams(
            dimension_semantics=("parallel", "parallel", "parallel",
                                 "arbitrary")),
    )(qkv, qkv, qkv)


# ---------------------------------------------------------------------------
# One-time parameter preparation (hoisted out of the forward pass):
#   fold 1/sqrt(d) into the q columns of c_attn, cast weights to bf16.
# Weights are stored pre-transposed as (in_features, out_features), so kernels
# compute y = x @ W + b (equivalent to torch Linear's x @ W.T + b).
# ---------------------------------------------------------------------------
def prepare_params(wqkv, bqkv, wproj, bproj, *, n_head, scale=False):
    nx = wqkv.shape[0]
    d = nx // n_head
    if scale:
        s = 1.0 / math.sqrt(d)
        wqkv = wqkv.at[:, :nx].multiply(s)
        bqkv = bqkv.at[:, :nx].multiply(s)
    return (wqkv.astype(jnp.bfloat16), bqkv.astype(jnp.float32),
            wproj.astype(jnp.bfloat16), bproj.astype(jnp.float32))


# ---------------------------------------------------------------------------
# Full Attention forward (c_attn -> causal attention -> c_proj).
# Weights must come from prepare_params (already scaled, bf16).
# ---------------------------------------------------------------------------
def attention_forward(x, wqkv, bqkv, wproj, bproj, *, n_head, block=256):
    B, T, nx = x.shape
    d = nx // n_head

    # c_attn over the flattened (B*T, nx) activations; bf16 in, bf16 out
    # (feeds the attention kernel with no further casts).
    x2 = x.reshape(B * T, nx).astype(jnp.bfloat16)
    qkv = linear(x2, wqkv, bqkv, out_dtype=jnp.bfloat16)      # (B*T, 3*nx)

    # Free, row-major reshape: columns are [q_h0..q_hH-1 | k_... | v_...].
    qkv = qkv.reshape(B, T, 3, n_head, d)

    # Causal flash attention; output is already in merged (B, T, H, d) layout.
    a = flash_attention(qkv, block=block)                     # (B, T, H, d)

    # c_proj directly on the merged layout (free reshape, no transpose).
    out = linear(a.reshape(B * T, nx), wproj, bproj, out_dtype=x.dtype)
    return out.reshape(B, T, nx)


# ---------------------------------------------------------------------------
# Pure-JAX reference mirroring the PyTorch module (f32 end to end).
# ---------------------------------------------------------------------------
def reference_forward(x, wqkv, bqkv, wproj, bproj, *, n_head, scale=True):
    B, T, nx = x.shape
    d = nx // n_head
    qkv = x @ wqkv + bqkv[0]
    q, k, v = jnp.split(qkv, 3, axis=-1)

    def split_heads(t):
        return t.reshape(B, T, n_head, d).transpose(0, 2, 1, 3)   # (B,H,T,d)

    q, k, v = split_heads(q), split_heads(k), split_heads(v)
    w = jnp.einsum("bhqd,bhkd->bhqk", q, k)
    if scale:
        w = w / math.sqrt(d)
    mask = jnp.tril(jnp.ones((T, T), jnp.float32))[None, None]
    w = w * mask - 1e10 * (1.0 - mask)
    p = jax.nn.softmax(w, axis=-1)
    a = jnp.einsum("bhqk,bhkd->bhqd", p, v)
    a = a.transpose(0, 2, 1, 3).reshape(B, T, nx)                 # merge_heads
    return a @ wproj + bproj[0]


if __name__ == "__main__":
    # Small shapes consistent with the module: nx=32, seq=8, n_head=4, batch=2.
    B, T, nx, n_head = 2, 8, 32, 4
    key = jax.random.PRNGKey(0)
    kx, kw1, kb1, kw2, kb2 = jax.random.split(key, 5)

    x = jax.random.normal(kx, (B, T, nx), dtype=jnp.float32)
    # nn.Linear(nx, 3*nx) / nn.Linear(nx, nx) weights, stored pre-transposed (in, out).
    wqkv = jax.random.normal(kw1, (nx, 3 * nx), dtype=jnp.float32) * 0.02
    bqkv = jax.random.normal(kb1, (1, 3 * nx), dtype=jnp.float32) * 0.02
    wproj = jax.random.normal(kw2, (nx, nx), dtype=jnp.float32) * 0.02
    bproj = jax.random.normal(kb2, (1, nx), dtype=jnp.float32) * 0.02

    params = prepare_params(wqkv, bqkv, wproj, bproj, n_head=n_head, scale=True)
    out = attention_forward(x, *params, n_head=n_head)
    out = jax.block_until_ready(out)

    ref = reference_forward(x, wqkv, bqkv, wproj, bproj, n_head=n_head, scale=True)
    assert out.shape == (B, T, nx)
    max_err = float(jnp.max(jnp.abs(out - ref)))
    # bf16 operands + approx reciprocal => relaxed tolerance vs the f32 reference.
    assert jnp.allclose(out, ref, atol=2e-2, rtol=2e-2), (
        f"mismatch vs JAX reference (max abs err {max_err})")

    print("KERNEL_OK")
</pallas_src>

<mosaic_0001>
module attributes {stable_mosaic.version = 11 : i64} {
  func.func @_linear_kernel(%arg0: i32, %arg1: i32, %arg2: i32, %arg3: memref<16x32xbf16, #tpu.memory_space<vmem>>, %arg4: memref<32x96xbf16, #tpu.memory_space<vmem>>, %arg5: memref<1x96xf32, #tpu.memory_space<vmem>>, %arg6: memref<16x96xbf16, #tpu.memory_space<vmem>>, %arg7: memref<16x96xf32, #tpu.memory_space<vmem>>) attributes {dimension_semantics = [#tpu.dimension_semantics<parallel>, #tpu.dimension_semantics<parallel>, #tpu.dimension_semantics<arbitrary>], iteration_bounds = array<i64: 1, 1, 1>, scalar_prefetch = 0 : i64, scratch_operands = 1 : i64, tpu.core_type = #tpu.core_type<tc>, window_params = [{transform_indices = @transform_0, window_bounds = array<i64: 16, 32>}, {transform_indices = @transform_1, window_bounds = array<i64: 32, 96>}, {transform_indices = @transform_2, window_bounds = array<i64: 1, 96>}, {transform_indices = @transform_3, window_bounds = array<i64: 16, 96>}]} {
    %c0_i32 = arith.constant 0 : i32
    %0 = arith.cmpi eq, %arg2, %c0_i32 : i32
    %1 = arith.extui %0 : i1 to i32
    %c0_i32_0 = arith.constant 0 : i32
    %2 = arith.cmpi ne, %1, %c0_i32_0 : i32
    scf.if %2 {
      %cst_10 = arith.constant 0.000000e+00 : f32
      %12 = vector.broadcast %cst_10 : f32 to vector<16x96xf32>
      %c0_11 = arith.constant 0 : index
      %c0_12 = arith.constant 0 : index
      %13 = vector.load %arg7[%c0_11, %c0_12] : memref<16x96xf32, #tpu.memory_space<vmem>>, vector<16x96xf32>
      tpu.vector_store %arg7[%c0_11, %c0_12], %12 {strides = array<i32>} : memref<16x96xf32, #tpu.memory_space<vmem>>, vector<16x96xf32>,
    } else {
    }
    %c0 = arith.constant 0 : index
    %c0_1 = arith.constant 0 : index
    %3 = vector.load %arg7[%c0, %c0_1] : memref<16x96xf32, #tpu.memory_space<vmem>>, vector<16x96xf32>
    %c0_2 = arith.constant 0 : index
    %c0_3 = arith.constant 0 : index
    %4 = vector.load %arg3[%c0_2, %c0_3] : memref<16x32xbf16, #tpu.memory_space<vmem>>, vector<16x32xbf16>
    %c0_4 = arith.constant 0 : index
    %c0_5 = arith.constant 0 : index
    %5 = vector.load %arg4[%c0_4, %c0_5] : memref<32x96xbf16, #tpu.memory_space<vmem>>, vector<32x96xbf16>
    %cst = arith.constant dense<0.000000e+00> : vector<16x96xf32>
    %6 = tpu.matmul %4, %5, %cst {dimension_numbers = #tpu.dot_dimension_numbers<[1], [0], [0], [1], [0, 0, 1, 1], [], []>} : vector<16x32xbf16>, vector<32x96xbf16>, vector<16x96xf32> -> vector<16x96xf32>
    %7 = arith.addf %3, %6 : vector<16x96xf32>
    %c0_6 = arith.constant 0 : index
    %c0_7 = arith.constant 0 : index
    %8 = vector.load %arg7[%c0_6, %c0_7] : memref<16x96xf32, #tpu.memory_space<vmem>>, vector<16x96xf32>
    tpu.vector_store %arg7[%c0_6, %c0_7], %7 {strides = array<i32>} : memref<16x96xf32, #tpu.memory_space<vmem>>, vector<16x96xf32>,
    %c0_i32_8 = arith.constant 0 : i32
    %9 = arith.cmpi eq, %arg2, %c0_i32_8 : i32
    %10 = arith.extui %9 : i1 to i32
    %c0_i32_9 = arith.constant 0 : i32
    %11 = arith.cmpi ne, %10, %c0_i32_9 : i32
    scf.if %11 {
      %c0_10 = arith.constant 0 : index
      %c0_11 = arith.constant 0 : index
      %12 = vector.load %arg7[%c0_10, %c0_11] : memref<16x96xf32, #tpu.memory_space<vmem>>, vector<16x96xf32>
      %c0_12 = arith.constant 0 : index
      %c0_13 = arith.constant 0 : index
      %13 = vector.load %arg5[%c0_12, %c0_13] : memref<1x96xf32, #tpu.memory_space<vmem>>, vector<1x96xf32>
      %14 = vector.broadcast %13 : vector<1x96xf32> to vector<16x96xf32>
      %15 = arith.addf %12, %14 : vector<16x96xf32>
      %16 = arith.truncf %15 : vector<16x96xf32> to vector<16x96xbf16>
      %c0_14 = arith.constant 0 : index
      %c0_15 = arith.constant 0 : index
      %17 = vector.load %arg6[%c0_14, %c0_15] : memref<16x96xbf16, #tpu.memory_space<vmem>>, vector<16x96xbf16>
      tpu.vector_store %arg6[%c0_14, %c0_15], %16 {strides = array<i32>} : memref<16x96xbf16, #tpu.memory_space<vmem>>, vector<16x96xbf16>,
    } else {
    }
    return
  }
  func.func @transform_0(%arg0: i32, %arg1: i32, %arg2: i32) -> (i32, i32) {
    %c0_i32 = arith.constant 0 : i32
    return %arg0, %arg2 : i32, i32
  }
  func.func @transform_1(%arg0: i32, %arg1: i32, %arg2: i32) -> (i32, i32) {
    %c0_i32 = arith.constant 0 : i32
    return %arg2, %arg1 : i32, i32
  }
  func.func @transform_2(%arg0: i32, %arg1: i32, %arg2: i32) -> (i32, i32) {
    %c0_i32 = arith.constant 0 : i32
    %c0_i32_0 = arith.constant 0 : i32
    return %c0_i32, %arg1 : i32, i32
  }
  func.func @transform_3(%arg0: i32, %arg1: i32, %arg2: i32) -> (i32, i32) {
    %c0_i32 = arith.constant 0 : i32
    return %arg0, %arg1 : i32, i32
  }
}

</mosaic_0001>

<bundles_post_ra>
// kernel: tpu_custom_call.1
= control target key start
LH: loop header
LB: loop body
LE: loop exit
PB: predicated region body
PF: predicated region fallthrough
CT: control target
= control target key end

     0   :  { %8 = vsyncpa [#allocation4], 0  ;;  %s291_s0 = inlined_call_operand.hbm [shape: bf16[16,32], index: 0, kind: input, shape index: {}]   ;;  %s292_s1 = inlined_call_operand.hbm [shape: bf16[32,96], index: 1, kind: input, shape index: {}]   ;;  %s293_s2 = inlined_call_operand.vmem [shape: f32[1,96], index: 2, kind: input, shape index: {}]   ;;  %s294_s3 = inlined_call_operand.hbm [shape: bf16[16,96], index: 3, kind: output, shape index: {}]  }
   0x1   :  { %9 = vsyncpa [#allocation7], 0 }
   0x2   :  { %10 = vsyncpa [#allocation5], 0  ;;  %s15_s14 = sshll.u32 %s291_s0, 4  ;;  %s240_s15 = smov [#allocation3]   ;;  %s16_s14 = int_to_ptr.hbm [resolvable:$true] %s15_s14 }
   0x3   :  { %s17_s16 = sshll.u32 %s240_s15, 4  ;;  %s28_s19 = sshll.u32 %s292_s1, 4  ;;  %s18_s16 = int_to_ptr.vmem [resolvable:$true] %s17_s16  ;;  %s29_s19 = int_to_ptr.hbm [resolvable:$true] %s28_s19 }
   0x4   :  { %s241_s20 = smov 64   ;;  %s242_s21 = smov 4  }
   0x5   :  { %23 = dma.hbm_to_vmem [thread:$0]  %s16_s14, 128, %s18_s16, [#allocation4], %s241_s20, %s241_s20, %s242_s21  }
   0x6   :  { %s243_s22 = smov [#allocation6]  }
   0x7   :  { %s30_s23 = sshll.u32 %s243_s22, 4  ;;  %s31_s23 = int_to_ptr.vmem [resolvable:$true] %s30_s23 }
   0x8   :  { %36 = dma.hbm_to_vmem [thread:$0]  %s29_s19, 256, %s31_s23, [#allocation7], %s241_s20, %s241_s20, %s242_s21  }
   0x9   :  { %234 = dma.done.wait [#allocation4], 128  }
   0xa   :  { %235 = vsyncadd [#allocation4], 4294967168 }
   0xb   :  { %236 = dma.done.wait [#allocation7], 256  }
   0xc   :  { %237 = vsyncadd [#allocation7], 4294967040  ;;  %vm52_vm0 = vcmask 785408   ;;  %v244_v0 = vmov 0.0   ;;  %v154_v1 = vld [vmem:[#allocation6 + $0x8] sm:$0xff]  ;;  %v153_v2 = vld [vmem:[#allocation6] sm:$0xff] }
   0xd   :  { %53 = vst.msk [vmem:[#allocation2] sm:$0xff] %vm52_vm0, %v244_v0  ;;  %90 = vmatpush.bf16.msra.mxu0 %v154_v1  ;;  %v152_v3 = vld [vmem:[#allocation3] sm:$0xff]  ;;  %vm80_vm1 = vcmask 261120   ;;  %v161_v8 = vld [vmem:[%s293_s2] ss:$0 sm:$0xff]  ;;  %vm116_vm2 = vcmask 781312  }
   0xe   :  { %54 = vst.msk [vmem:[#allocation2 + $0x8] sm:$0xff] %vm52_vm0, %v244_v0  ;;  %s245_s24 = smov [#allocation8]   ;;  %s125_s28 = sshll.u32 %s294_s3, 4  ;;  %s126_s28 = int_to_ptr.hbm [resolvable:$true] %s125_s28 }
   0xf   :  { %s123_s25 = sshll.u32 %s245_s24, 4  ;;  %s124_s25 = int_to_ptr.vmem [resolvable:$true] %s123_s25 }
  0x11   :  { %91 = vmatpush.bf16.msra.mxu0 %v153_v2 }
  0x14   :  { %151 = vmatmul.msk.bf16.vlgmr.msra.gmra.mxu0 %vm80_vm1, %v152_v3  ;;  %v55_v4 = vld [vmem:[#allocation2] sm:$0xff] }
  0x15   :  { %v56_v7 = vld [vmem:[#allocation2 + $0x8] sm:$0xff] }
  0x91   :  { %v93_v5 = vpop.f32.mrf.mxu0 }
  0x92   :  { %v98_v6 = vadd.f32 %v93_v5, %v55_v4 }
  0x94   :  { %101 = vst.msk [vmem:[#allocation2] sm:$0xff] %vm52_vm0, %v98_v6 }
  0x99   :  { %v95_v9 = vpop.f32.mrf.mxu0 }
  0x9a   :  { %v99_v10 = vadd.f32 %v95_v9, %v56_v7 }
  0x9b   :  { %v106_v11 = vld [vmem:[#allocation2] sm:$0xff] }
  0x9c   :  { %102 = vst.msk [vmem:[#allocation2 + $0x8] sm:$0xff] %vm52_vm0, %v99_v10  ;;  %v112_v12 = vadd.f32 %v161_v8, %v106_v11 }
  0x9e   :  { %v114_v13 = vpack.c.bf16 %v112_v12, %v112_v12 }
  0xa0   :  { %117 = vst.msk [vmem:[#allocation8] sm:$0xf] %vm116_vm2, %v114_v13 }
  0xa3   :  { %v107_v14 = vld [vmem:[#allocation2 + $0x8] sm:$0xff] }
  0xa4   :  { %v113_v15 = vadd.f32 %v161_v8, %v107_v14 }
  0xa6   :  { %v115_v16 = vpack.c.bf16 %v113_v15, %v113_v15 }
  0xa8   :  { %118 = vst.msk [vmem:[#allocation8 + $0x4] sm:$0xf] %vm116_vm2, %v115_v16 }
  0xa9   :  { %131 = dma.vmem_to_hbm [thread:$0]  %s124_s25, 128, %s126_s28, [#allocation5], %s241_s20, %s241_s20, %s242_s21  }
  0xaa   :  { %238 = dma.done.wait [#allocation5], 128  }
  0xab   :  { %239 = vsyncadd [#allocation5], 4294967168 }
  0xac   :  { %136 = vsyncpa [#allocation4], 1 }
  0xad   :  { %137 = vsyncpa [#allocation7], 1 }
  0xae   :  { %138 = vsyncpa [#allocation5], 1 }

</bundles_post_ra>
